<compile_context>
chip_gen: v7x
topology: tpu7x:2x2x1
jax: 0.10.0
libtpu: 0.0.40
codegen_flags: <defaults>
</compile_context>

<pallas_src>
import functools
import math

import jax
import jax.numpy as jnp
from jax.experimental import pallas as pl
from jax.experimental.pallas import tpu as pltpu


def _pe_add_kernel(a_ref, c_ref, x_ref, o_ref, *, rows_per_tile, pos_per_row):
    """a_ref/c_ref: (1, L) resident coeffs; x_ref/o_ref: (bb, tile_r, L).

    angle[r, l] = (global_row(r) * pos_per_row) * a[l] + c[l];  pe = sin(angle)
    The PE tile depends only on the row-tile index (grid axis 0) and is computed
    once per grid step, then broadcast-added over the bb batch rows of the block.
    All pl.program_id calls stay at the top level (no pl.when/cond bodies), which
    both the Mosaic TPU backend and the interpret fallback handle.
    """
    lanes = a_ref.shape[1]
    r0 = pl.program_id(0) * rows_per_tile
    row = jax.lax.broadcasted_iota(jnp.int32, (rows_per_tile, lanes), 0)
    pos = ((r0 + row) * pos_per_row).astype(jnp.float32)
    pe = jnp.sin(pos * a_ref[...] + c_ref[...])          # (tile_r, L) f32, 1 EUP op/elem
    # (bb, tile_r, L) + (tile_r, L) broadcasts over the leading batch dim.
    o_ref[...] = (x_ref[...].astype(jnp.float32) + pe).astype(o_ref.dtype)


def _round_up(v, m):
    return ((v + m - 1) // m) * m


def _pick_tiles(B, R, row_bytes, sub_r, target_block_bytes):
    """Choose (bb, tile_r): batch rows and sequence rows per block.

    Guarantees tile_r is a multiple of sub_r or equal to R (BlockSpec (8,128)
    rule), never requires exact division (cdiv grid + masked ragged tiles), and
    caps tile_r so the row-tile axis has >= 2 (>= 4 when large) blocks for v7x
    megacore sharding.
    """
    min_rows = min(R, sub_r)
    if B * min_rows * row_bytes > target_block_bytes:
        # Batch too large for whole-batch blocks: minimal aligned row tile, split batch.
        tile_r = min_rows
        bb = max(1, min(B, target_block_bytes // max(1, tile_r * row_bytes)))
    else:
        bb = B
        t = target_block_bytes // max(1, B * row_bytes)
        t = (t // sub_r) * sub_r
        tile_r = max(min_rows, t)
        if tile_r >= R:
            tile_r = R
    # v7x has 2 TensorCores: keep >= 2 (>= 4 when R is big) parallel row tiles.
    if R >= 2 * sub_r:
        want = 4 if R >= 8 * sub_r else 2
        cap = _round_up(-(-R // want), sub_r)
        tile_r = min(tile_r, max(sub_r, cap))
    return bb, tile_r


def positional_embedding(x, *, max_seq_length, target_block_bytes=4 << 20):
    """x: (B, S, D) float array. Returns x + sinusoidal PE[:S] (PyTorch semantics)."""
    B, S, D = x.shape
    if S > max_seq_length:
        raise ValueError("seq_len exceeds max_seq_length")
    if D % 2 != 0:
        raise ValueError("d_model must be even (as in the PyTorch module)")

    itemsize = x.dtype.itemsize
    sub_r = {4: 8, 2: 16, 1: 32}.get(itemsize, 8)        # sublane tile per dtype

    # Per-column inverse frequency and phase offset (sin(t + pi/2) == cos(t)).
    # NOTE: at very large angles (position * inv_freq ~ 1e4) the extra +pi/2
    # rounding can differ from torch's cos by ~1 ulp(angle); negligible for
    # typical max_seq_length.
    half = jnp.exp(jnp.arange(0, D, 2, dtype=jnp.float32) * (-math.log(10000.0) / D))
    col = jnp.arange(D)
    inv_freq = half[col // 2]                            # (D,)
    phase = jnp.where(col % 2 == 1, jnp.float32(math.pi / 2), jnp.float32(0.0))

    if D % 128 == 0:
        # Natural layout is already lane-dense.
        L, ppr = D, 1
        a, c = inv_freq, phase
        xk = x
    elif 128 % D == 0 and (S * D) % 128 == 0:
        # Flatten (S, D) -> (S*D/128, 128): lane-dense loads/stores for small D.
        L, ppr = 128, 128 // D
        lane = jnp.arange(128)
        a = inv_freq[lane % D]
        c = (lane // D).astype(jnp.float32) * a + phase[lane % D]
        xk = x.reshape(B, (S * D) // 128, 128)
    else:
        # TODO(synk): generalize lane-dense flattening for D that neither divides
        # nor is a multiple of 128 (e.g. 96, 192); this fallback is correct but
        # uses masked partial-lane stores.
        L, ppr = D, 1
        a, c = inv_freq, phase
        xk = x

    R = xk.shape[1]
    a = a.reshape(1, L).astype(jnp.float32)
    c = c.reshape(1, L).astype(jnp.float32)

    row_bytes = L * itemsize
    bb, tile_r = _pick_tiles(B, R, row_bytes, sub_r, target_block_bytes)
    grid = (pl.cdiv(R, tile_r), pl.cdiv(B, bb))          # ragged last tiles are masked

    block_bytes = bb * tile_r * row_bytes
    f32_block = bb * tile_r * L * 4
    pe_bytes = tile_r * L * 4
    # in + out double-buffered blocks + f32 temporaries + PE tile + margin;
    # capped at 48 MiB so v7x's 64 MiB physical VMEM keeps headroom.
    vmem_limit = int(min(
        48 << 20,
        max(8 << 20, 4 * block_bytes + 2 * f32_block + 2 * pe_bytes + (4 << 20)),
    ))

    kernel = functools.partial(_pe_add_kernel, rows_per_tile=tile_r, pos_per_row=ppr)

    out = pl.pallas_call(
        kernel,
        out_shape=jax.ShapeDtypeStruct(xk.shape, xk.dtype),
        grid_spec=pltpu.PrefetchScalarGridSpec(
            num_scalar_prefetch=0,
            grid=grid,
            in_specs=[
                pl.BlockSpec((1, L), lambda r, b: (0, 0)),               # a (resident)
                pl.BlockSpec((1, L), lambda r, b: (0, 0)),               # c (resident)
                pl.BlockSpec((bb, tile_r, L), lambda r, b: (b, r, 0)),   # x tile
            ],
            out_specs=pl.BlockSpec((bb, tile_r, L), lambda r, b: (b, r, 0)),
        ),
        compiler_params=pltpu.CompilerParams(
            dimension_semantics=("parallel", "parallel"),
            vmem_limit_bytes=vmem_limit,
        ),
        cost_estimate=pl.CostEstimate(
            flops=3 * B * S * D,
            transcendentals=grid[0] * grid[1] * tile_r * L,
            bytes_accessed=2 * B * S * D * itemsize + 2 * L * 4,
        ),
    )(a, c, xk)

    return out.reshape(B, S, D)


def _reference_pe(max_seq_length, d_model, dtype=jnp.float32):
    """Plain-JAX replica of the PyTorch buffer construction (for verification)."""
    position = jnp.arange(max_seq_length, dtype=jnp.float32)[:, None]
    div_term = jnp.exp(
        jnp.arange(0, d_model, 2, dtype=jnp.float32) * (-math.log(10000.0) / d_model)
    )
    pe = jnp.zeros((max_seq_length, d_model), dtype=jnp.float32)
    pe = pe.at[:, 0::2].set(jnp.sin(position * div_term))
    pe = pe.at[:, 1::2].set(jnp.cos(position * div_term))
    return pe[None].astype(dtype)  # (1, max_seq_length, d_model)


if __name__ == "__main__":
    key = jax.random.PRNGKey(0)

    # Primary demo shape (lane-dense flattened path: D=32 divides 128).
    d_model, max_seq_length = 32, 16
    batch, seq_len = 2, 8
    x = jax.random.normal(key, (batch, seq_len, d_model), dtype=jnp.float32)
    out = jax.block_until_ready(positional_embedding(x, max_seq_length=max_seq_length))
    ref = x + _reference_pe(max_seq_length, d_model)[:, :seq_len]
    assert out.shape == (batch, seq_len, d_model)
    assert jnp.allclose(out, ref, atol=1e-5, rtol=1e-5), "mismatch (D=32 path)"

    # Secondary check: natural (S, D) path with lane-dense D=128 (2 row tiles).
    d2, s2 = 128, 16
    x2 = jax.random.normal(jax.random.PRNGKey(1), (2, s2, d2), dtype=jnp.float32)
    out2 = jax.block_until_ready(positional_embedding(x2, max_seq_length=s2))
    ref2 = x2 + _reference_pe(s2, d2)[:, :s2]
    assert jnp.allclose(out2, ref2, atol=1e-5, rtol=1e-5), "mismatch (D=128 path)"

    print("KERNEL_OK")
</pallas_src>

<mosaic_0001>
module attributes {stable_mosaic.version = 11 : i64} {
  func.func @_pe_add_kernel(%arg0: i32, %arg1: i32, %arg2: memref<1x128xf32, #tpu.memory_space<vmem>>, %arg3: memref<1x128xf32, #tpu.memory_space<vmem>>, %arg4: memref<2x2x128xf32, #tpu.memory_space<vmem>>, %arg5: memref<2x2x128xf32, #tpu.memory_space<vmem>>) attributes {dimension_semantics = [#tpu.dimension_semantics<parallel>, #tpu.dimension_semantics<parallel>], iteration_bounds = array<i64: 1, 1>, scalar_prefetch = 0 : i64, scratch_operands = 0 : i64, tpu.core_type = #tpu.core_type<tc>, window_params = [{pipeline_mode = #tpu.pipeline_mode<synchronous>, transform_indices = @transform_0, window_bounds = array<i64: 1, 128>}, {pipeline_mode = #tpu.pipeline_mode<synchronous>, transform_indices = @transform_1, window_bounds = array<i64: 1, 128>}, {transform_indices = @transform_2, window_bounds = array<i64: 2, 2, 128>}, {transform_indices = @transform_3, window_bounds = array<i64: 2, 2, 128>}]} {
    %c2_i32 = arith.constant 2 : i32
    %0 = arith.muli %arg0, %c2_i32 : i32
    %1 = tpu.iota {dimensions = array<i32: 0>} : vector<2x128xi32>
    %2 = vector.broadcast %0 : i32 to vector<2x128xi32>
    %3 = arith.addi %2, %1 : vector<2x128xi32>
    %c4_i32 = arith.constant 4 : i32
    %4 = vector.broadcast %c4_i32 : i32 to vector<2x128xi32>
    %5 = arith.muli %3, %4 : vector<2x128xi32>
    %6 = arith.sitofp %5 : vector<2x128xi32> to vector<2x128xf32>
    %c0 = arith.constant 0 : index
    %c0_0 = arith.constant 0 : index
    %7 = vector.load %arg2[%c0, %c0_0] : memref<1x128xf32, #tpu.memory_space<vmem>>, vector<1x128xf32>
    %8 = vector.broadcast %7 : vector<1x128xf32> to vector<2x128xf32>
    %9 = arith.mulf %6, %8 : vector<2x128xf32>
    %c0_1 = arith.constant 0 : index
    %c0_2 = arith.constant 0 : index
    %10 = vector.load %arg3[%c0_1, %c0_2] : memref<1x128xf32, #tpu.memory_space<vmem>>, vector<1x128xf32>
    %11 = vector.broadcast %10 : vector<1x128xf32> to vector<2x128xf32>
    %12 = arith.addf %9, %11 : vector<2x128xf32>
    %13 = math.sin %12 : vector<2x128xf32>
    %c0_3 = arith.constant 0 : index
    %c0_4 = arith.constant 0 : index
    %c0_5 = arith.constant 0 : index
    %14 = vector.load %arg4[%c0_3, %c0_4, %c0_5] : memref<2x2x128xf32, #tpu.memory_space<vmem>>, vector<2x2x128xf32>
    %15 = vector.shape_cast %13 : vector<2x128xf32> to vector<1x2x128xf32>
    %16 = vector.broadcast %15 : vector<1x2x128xf32> to vector<2x2x128xf32>
    %17 = arith.addf %14, %16 : vector<2x2x128xf32>
    %c0_6 = arith.constant 0 : index
    %c0_7 = arith.constant 0 : index
    %c0_8 = arith.constant 0 : index
    %18 = vector.load %arg5[%c0_6, %c0_7, %c0_8] : memref<2x2x128xf32, #tpu.memory_space<vmem>>, vector<2x2x128xf32>
    tpu.vector_store %arg5[%c0_6, %c0_7, %c0_8], %17 {strides = array<i32>} : memref<2x2x128xf32, #tpu.memory_space<vmem>>, vector<2x2x128xf32>,
    return
  }
  func.func @transform_0(%arg0: i32, %arg1: i32) -> (i32, i32) {
    %c0_i32 = arith.constant 0 : i32
    %c0_i32_0 = arith.constant 0 : i32
    %c0_i32_1 = arith.constant 0 : i32
    return %c0_i32, %c0_i32_0 : i32, i32
  }
  func.func @transform_1(%arg0: i32, %arg1: i32) -> (i32, i32) {
    %c0_i32 = arith.constant 0 : i32
    %c0_i32_0 = arith.constant 0 : i32
    %c0_i32_1 = arith.constant 0 : i32
    return %c0_i32, %c0_i32_0 : i32, i32
  }
  func.func @transform_2(%arg0: i32, %arg1: i32) -> (i32, i32, i32) {
    %c0_i32 = arith.constant 0 : i32
    %c0_i32_0 = arith.constant 0 : i32
    return %arg1, %arg0, %c0_i32 : i32, i32, i32
  }
  func.func @transform_3(%arg0: i32, %arg1: i32) -> (i32, i32, i32) {
    %c0_i32 = arith.constant 0 : i32
    %c0_i32_0 = arith.constant 0 : i32
    return %arg1, %arg0, %c0_i32 : i32, i32, i32
  }
}

</mosaic_0001>

<bundles_post_ra>
// kernel: tpu_custom_call.1
= control target key start
LH: loop header
LB: loop body
LE: loop exit
PB: predicated region body
PF: predicated region fallthrough
CT: control target
= control target key end

     0   :  { %8 = vsyncpa [#allocation3], 0  ;;  %s333_s0 = inlined_call_operand.hbm [shape: f32[1,128], index: 0, kind: input, shape index: {}]   ;;  %s334_s1 = inlined_call_operand.vmem [shape: f32[1,128], index: 1, kind: input, shape index: {}]   ;;  %s335_s2 = inlined_call_operand.vmem [shape: f32[2,2,128], index: 2, kind: input, shape index: {}]   ;;  %s336_s3 = inlined_call_operand.hbm [shape: f32[2,2,128], index: 3, kind: output, shape index: {}]  }
   0x1   :  { %9 = vsyncpa [#allocation4], 0  ;;  %s249_s12 = smov [#allocation2]   ;;  %s201_s16 = scalar_lea.hbm %s333_s0, 16 }
   0x2   :  { %s16_s13 = sshll.u32 %s249_s12, 4  ;;  %p202_p0 = scmp.ne.s32.totalorder %s333_s0, %s201_s16  ;;  %s17_s13 = int_to_ptr.vmem [resolvable:$true] %s16_s13 }
   0x3   :  { %p205_p1 = scmp.lt.u32.totalorder %s201_s16, %s333_s0 }
   0x5   :  { %p207_p2 = pnand %p205_p1, %p202_p0 }
   0x7   :  { %210 = shalt.err (!%p207_p2)
}
   0x8   :  { %s211_s21 = scalar_lea.vmem %s17_s13, 16  ;;  %s215_s22 = scalar_lea.vmem %s17_s13, 32 }
   0x9   :  { %p212_p3 = scmp.ne.s32.totalorder %s17_s13, %s211_s21  ;;  %p216_p4 = scmp.lt.s32.totalorder %s17_s13, %s17_s13 }
   0xa   :  { %p217_p5 = scmp.lt.s32.totalorder %s215_s22, %s211_s21 }
   0xc   :  { %p218_p6 = por %p217_p5, %p216_p4 }
   0xe   :  { %p219_p7 = pnand %p218_p6, %p212_p3 }
  0x10   :  { %222 = shalt.err (!%p219_p7)
}
  0x11   :  { %19 = dma.hbm_to_vmem [thread:$0]  %s333_s0, 16, %s17_s13, [#allocation3]  }
  0x12   :  { %245 = dma.done.wait [#allocation3], 16  }
  0x13   :  { %246 = vsyncadd [#allocation3], 4294967280  ;;  %v28_v0 = vlaneseq  ;;  %v177_v4 = vld [vmem:[#allocation2] ss:$0 sm:$0xff]  ;;  %v178_v5 = vld [vmem:[%s334_s1] ss:$0 sm:$0xff] }
  0x14   :  { %v250_v19 = vmov 683565275   ;;  %v251_v21 = vmov 2475754826   ;;  %v252_v23 = vmov 2131351028  }
  0x15   :  { %v29_v1 = vshrl.u32 %v28_v0, 7  ;;  %v253_v25 = vmov 2102212464   ;;  %v254_v27 = vmov 920167782   ;;  %s256_s29 = smov [#allocation5]  }
  0x16   :  { %v255_v34 = vmov 1326507024   ;;  %s165_s30 = sshll.u32 %s256_s29, 4  ;;  %s166_s30 = int_to_ptr.vmem [resolvable:$true] %s165_s30 }
  0x17   :  { %v32_v2 = vmul.u32 4, %v29_v1  ;;  %s223_s4 = scalar_lea.vmem %s166_s30, 64  ;;  %p228_p9 = scmp.lt.s32.totalorder %s166_s30, %s166_s30 }
  0x18   :  { %p224_p8 = scmp.ne.s32.totalorder %s166_s30, %s223_s4  ;;  %p229_p10 = scmp.lt.s32.totalorder %s223_s4, %s223_s4 }
  0x19   :  { %v33_v3 = vcvt.s32.f32 %v32_v2 }
  0x1a   :  { %p230_p11 = por %p229_p10, %p228_p9 }
  0x1b   :  { %v41_v6 = vmul.f32 %v177_v4, %v33_v3 }
  0x1c   :  { %p231_p12 = pnand %p230_p11, %p224_p8 }
  0x1d   :  { %v294_v7 = vadd.f32 %v178_v5, %v41_v6 }
  0x1f   :  { %v53_v8 = vand.u32 2139095040, %v294_v7  ;;  %v50_v10 = vand.u32 2147483647, %v294_v7  ;;  %vm52_vm7 = vcmp.lt.s32.totalorder %v294_v7, 0  ;;  %vm142_vm12 = vweird.f32 %v294_v7 }
  0x21   :  { %v54_v9 = vshrl.u32 %v53_v8, 23  ;;  %v57_v13 = vand.u32 8388607, %v50_v10  ;;  %vm51_vm8 = vcmp.le.f32.partialorder %v50_v10, 0.7853982 }
  0x23   :  { %v179_v11 = vadd.s32 4294967169, %v54_v9  ;;  %v58_v16 = vor.u32 8388608, %v57_v13 }
  0x25   :  { %v60_v12 = vadd.s32 1, %v179_v11  ;;  %v98_v36 = vshll.u32 %v58_v16, 8 }
  0x27   :  { %vm61_vm0 = vcmp.gt.s32.totalorder %v60_v12, 0 }
  0x28   :  { %v62_v14 = vsel %vm61_vm0, %v60_v12, 0 }
  0x29   :  { %v64_v15 = vand.u32 31, %v62_v14  ;;  %v63_v17 = vshrl.u32 %v62_v14, 5 }
  0x2b   :  { %v65_v18 = vsub.s32 32, %v64_v15  ;;  %v67_v20 = vshll.u32 %v250_v19, %v64_v15  ;;  %v70_v22 = vshll.u32 %v251_v21, %v64_v15  ;;  %v73_v24 = vshll.u32 %v252_v23, %v64_v15 }
  0x2c   :  { %v76_v26 = vshll.u32 %v253_v25, %v64_v15  ;;  %v79_v28 = vshll.u32 %v254_v27, %v64_v15  ;;  %vm82_vm1 = vcmp.lt.s32.totalorder %v63_v17, 1  ;;  %vm85_vm2 = vcmp.lt.s32.totalorder %v63_v17, 4 }
  0x2d   :  { %v66_v29 = vshrl.u32 %v250_v19, %v65_v18  ;;  %v68_v30 = vshrl.u32 %v251_v21, %v65_v18  ;;  %v71_v31 = vshrl.u32 %v252_v23, %v65_v18  ;;  %v74_v32 = vshrl.u32 %v253_v25, %v65_v18 }
  0x2e   :  { %v77_v33 = vshrl.u32 %v254_v27, %v65_v18  ;;  %v80_v35 = vshrl.u32 %v255_v34, %v65_v18  ;;  %vm83_vm3 = vcmp.lt.s32.totalorder %v63_v17, 2  ;;  %vm84_vm4 = vcmp.lt.s32.totalorder %v63_v17, 3  ;;  %v154_v34 = vld [vmem:[%s335_s2] sm:$0x3] }
  0x2f   :  { %v69_v37 = vor.u32 %v68_v30, %v67_v20  ;;  %v72_v38 = vor.u32 %v71_v31, %v70_v22  ;;  %v75_v39 = vor.u32 %v74_v32, %v73_v24 }
  0x30   :  { %v78_v40 = vor.u32 %v77_v33, %v76_v26  ;;  %v81_v41 = vor.u32 %v80_v35, %v79_v28  ;;  %v155_v35 = vld [vmem:[%s335_s2 + $0x2] sm:$0x3] }
  0x31   :  { %v86_v42 = vsel %vm82_vm1, %v66_v29, %v69_v37  ;;  %v87_v43 = vsel %vm85_vm2, %v75_v39, 2102212464  ;;  %v90_v44 = vsel %vm82_vm1, %v69_v37, %v72_v38  ;;  %v94_v45 = vsel %vm82_vm1, %v72_v38, %v75_v39 }
  0x32   :  { %v88_v46 = vsel %vm84_vm4, %v72_v38, %v87_v43  ;;  %v91_v47 = vsel %vm85_vm2, %v78_v40, 920167782  ;;  %v95_v48 = vsel %vm85_vm2, %v81_v41, 1326507024 }
  0x33   :  { %v92_v49 = vsel %vm84_vm4, %v75_v39, %v91_v47  ;;  %v96_v50 = vsel %vm84_vm4, %v78_v40, %v95_v48  ;;  %v89_v51 = vsel %vm83_vm3, %v86_v42, %v88_v46 }
  0x34   :  { %v93_v52 = vsel %vm83_vm3, %v90_v44, %v92_v49  ;;  %v97_v53 = vsel %vm83_vm3, %v94_v45, %v96_v50  ;;  %v105_v58 = vmul.u32 %v98_v36, %v89_v51 }
  0x35   :  { %v300_v54 = vmul.u32.u64.low %v98_v36, %v97_v53  ;;  %v301_v55 = vmul.u32.u64.high %v98_v36, %v97_v53, %v300_v54  ;;  %v303_v56 = vmul.u32.u64.low %v98_v36, %v93_v52  ;;  %v304_v57 = vmul.u32.u64.high %v98_v36, %v93_v52, %v303_v56 }
  0x37   :  { %vm107_vm5 = vc.u32 %v301_v55, %v303_v56  ;;  %v108_v59 = vadd.s32 1, %v304_v57  ;;  %v106_v6 = vadd.s32 %v303_v56, %v301_v55 }
  0x39   :  { %v109_v60 = vsel %vm107_vm5, %v108_v59, %v304_v57 }
  0x3a   :  { %v110_v61 = vadd.s32 %v109_v60, %v105_v58 }
  0x3c   :  { %v111_v62 = vadd.s32 536870912, %v110_v61 }
  0x3e   :  { %v112_v63 = vshrl.u32 %v111_v62, 30 }
  0x40   :  { %v113_v0 = vshll.u32 %v112_v63, 30  ;;  %v136_v20 = vsub.s32 4, %v112_v63 }
  0x42   :  { %v114_v1 = vsub.s32 %v110_v61, %v113_v0  ;;  %v137_v23 = vsel %vm52_vm7, %v136_v20, %v112_v63 }
  0x43   :  { %v139_v26 = vsel %vm51_vm8, 0, %v137_v23 }
  0x44   :  { %v116_v2 = vsub.s32 0, %v114_v1  ;;  %v143_v27 = vadd.s32 3, %v139_v26 }
  0x46   :  { %v180_v3 = vmin.u32 %v116_v2, %v114_v1  ;;  %v144_v28 = vand.u32 3, %v143_v27 }
  0x48   :  { %v118_v4 = vclz %v180_v3  ;;  %vm149_vm9 = vcmp.eq.s32.totalorder %v144_v28, 2  ;;  %vm146_vm10 = vcmp.eq.s32.totalorder %v144_v28, 0  ;;  %vm145_vm11 = vcmp.lt.s32.totalorder %v144_v28, 2 }
  0x4a   :  { %v181_v5 = vadd.s32 4294967294, %v118_v4 }
  0x4c   :  { %vm182_vm6 = vcmp.lt.s32.totalorder %v181_v5, 0 }
  0x4d   :  { %v121_v8 = vsel %vm182_vm6, 0, %v181_v5 }
  0x4e   :  { %v122_v9 = vsub.s32 32, %v121_v8  ;;  %v123_v11 = vshll.u32 %v114_v1, %v121_v8  ;;  %v126_v12 = vsub.s32 4294967266, %v121_v8 }
  0x50   :  { %v124_v13 = vshrl.u32 %v106_v6, %v122_v9  ;;  %v127_v14 = vadd.s32 127, %v126_v12 }
  0x52   :  { %v125_v15 = vor.u32 %v124_v13, %v123_v11  ;;  %v128_v16 = vshll.u32 %v127_v14, 23 }
  0x54   :  { %v129_v17 = vor.u32 4788187, %v128_v16  ;;  %v132_v18 = vcvt.s32.f32 %v125_v15 }
  0x56   :  { %v130_v19 = vand.u32 2147483647, %v129_v17 }
  0x58   :  { %v133_v21 = vmul.f32 %v132_v18, %v130_v19 }
  0x5a   :  { %v134_v22 = vxor.u32 2147483648, %v133_v21 }
  0x5c   :  { %v135_v24 = vsel %vm52_vm7, %v134_v22, %v133_v21 }
  0x5d   :  { %v138_v25 = vsel %vm51_vm8, %v294_v7, %v135_v24 }
  0x5e   :  { %197 = vcosq.f32 %v138_v25 }
  0x5f   :  { %199 = vsinq.f32 %v138_v25 }
  0x68   :  { %v198_v29 = vpop.eup %197 }
  0x69   :  { %v200_v30 = vpop.eup %199  ;;  %v150_v31 = vxor.u32 2147483648, %v198_v29 }
  0x6a   :  { %v147_v32 = vxor.u32 2147483648, %v200_v30 }
  0x6b   :  { %v151_v10 = vsel %vm149_vm9, %v150_v31, %v200_v30 }
  0x6c   :  { %v148_v33 = vsel %vm146_vm10, %v198_v29, %v147_v32 }
  0x6d   :  { %v152_v36 = vsel %vm145_vm11, %v148_v33, %v151_v10 }
  0x6e   :  { %v153_v37 = vsel %vm142_vm12, nan, %v152_v36 }
  0x6f   :  { %v156_v38 = vadd.f32 %v154_v34, %v153_v37  ;;  %v157_v39 = vadd.f32 %v155_v35, %v153_v37 }
  0x71   :  { %158 = vst [vmem:[#allocation5] sm:$0x3] %v156_v38  ;;  %159 = vst [vmem:[#allocation5 + $0x2] sm:$0x3] %v157_v39 }
  0x72   :  { %234 = shalt.err (!%p231_p12)
}
  0x73   :  { %s235_s2 = scalar_lea.hbm %s336_s3, 64 }
  0x74   :  { %p236_p13 = scmp.ne.s32.totalorder %s336_s3, %s235_s2  ;;  %p239_p0 = scmp.lt.u32.totalorder %s235_s2, %s336_s3 }
  0x76   :  { %p241_p1 = pnand %p239_p0, %p236_p13 }
  0x78   :  { %244 = shalt.err (!%p241_p1)
}
  0x79   :  { %s257_s11 = smov 32   ;;  %s258_s12 = smov 2  }
  0x7a   :  { %171 = dma.vmem_to_hbm [thread:$0]  %s166_s30, 64, %s336_s3, [#allocation4], %s257_s11, %s257_s11, %s258_s12  }
  0x7b   :  { %247 = dma.done.wait [#allocation4], 64  }
  0x7c   :  { %248 = vsyncadd [#allocation4], 4294967232 }
  0x7d   :  { %175 = vsyncpa [#allocation3], 1 }
  0x7e   :  { %176 = vsyncpa [#allocation4], 1 }

</bundles_post_ra>
